<compile_context>
chip_gen: v7x
topology: tpu7x:2x2x1
jax: 0.10.0
libtpu: 0.0.40
codegen_flags: <defaults>
</compile_context>

<pallas_src>
import jax
import jax.numpy as jnp
from jax.experimental import pallas as pl
from jax.experimental.pallas import tpu as pltpu

# ---------------- model hyper-parameters (small, consistent with the module) --
INPUT_SIZE  = 16
HIDDEN_SIZE = 32
OUTPUT_SIZE = 8
NUM_RES_DNN = 2
NUM_DNN     = 2
DROPOUT     = 0.5          # eval mode -> identity (no RNG needed)
LN_EPS      = 1e-5         # PyTorch nn.LayerNorm default eps

BATCH       = 16
MAX_TM      = 512          # rows per grid step when batch is large

NL = NUM_RES_DNN * NUM_DNN # total number of inner DNN sublayers
NW = NL + 1                # NL DNN weights + [classifier]

# ---- row layout of the consolidated (NV, HIDDEN) vector stack ----------------
ROW_BP    = 0
ROW_BD    = ROW_BP + 1
ROW_GD    = ROW_BD + NL
ROW_BETAD = ROW_GD + NL
ROW_GR    = ROW_BETAD + NL
ROW_BETAR = ROW_GR + NUM_RES_DNN
ROW_BC    = ROW_BETAR + NUM_RES_DNN
NV        = ROW_BC + 1


def _layernorm(x, gamma, beta):
    mu  = jnp.mean(x, axis=-1, keepdims=True)
    var = jnp.mean((x - mu) ** 2, axis=-1, keepdims=True)
    return (x - mu) * jax.lax.rsqrt(var + LN_EPS) * gamma + beta


def res_dnn_kernel(x_ref, wp_ref, w_ref, v_ref, out_ref):
    # Load the whole (NV, HIDDEN) vector stack once; index in-register below.
    vec = v_ref[...]

    # prepare linear: (TM, INPUT) @ (INPUT, HIDDEN)
    h = jnp.dot(x_ref[...], wp_ref[...], preferred_element_type=jnp.float32)
    h = h + vec[ROW_BP]

    # residual DNN stack (static Python loops -> fully unrolled)
    for r in range(NUM_RES_DNN):
        shortcut = h
        for d in range(NUM_DNN):
            l = r * NUM_DNN + d
            h = jnp.dot(h, w_ref[l], preferred_element_type=jnp.float32)
            h = h + vec[ROW_BD + l]
            h = _layernorm(h, vec[ROW_GD + l], vec[ROW_BETAD + l])
            h = jnp.tanh(h)
            # Dropout(p) in eval mode is identity.
        h = shortcut + h
        h = _layernorm(h, vec[ROW_GR + r], vec[ROW_BETAR + r])
        h = jnp.tanh(h)
        # Dropout(p) in eval mode is identity.

    # classifier linear (Wc/bc zero-padded to HIDDEN output columns -> the
    # store is HIDDEN lanes wide; wrapper slices the valid OUTPUT_SIZE cols)
    out = jnp.dot(h, w_ref[NL], preferred_element_type=jnp.float32)
    out_ref[...] = (out + vec[ROW_BC]).astype(out_ref.dtype)


def pack_params(params):
    """Host-side consolidation of the 11 PyTorch-style tensors into 3 arrays."""
    (wp, bp, wd, bd, gd, betad, gr, betar, wc, bc) = params

    # (NW, HIDDEN, HIDDEN) weight stack: NL DNN weights + Wc zero-padded on the
    # output axis so every slot has the same shape.
    wc_pad = jnp.zeros((HIDDEN_SIZE, HIDDEN_SIZE), jnp.float32)
    wc_pad = wc_pad.at[:, :OUTPUT_SIZE].set(wc)
    w_stack = jnp.concatenate([wd, wc_pad[None]], axis=0)
    assert w_stack.shape == (NW, HIDDEN_SIZE, HIDDEN_SIZE)

    # (NV, HIDDEN) vector stack.
    bc_pad = jnp.zeros((1, HIDDEN_SIZE), jnp.float32)
    bc_pad = bc_pad.at[:, :OUTPUT_SIZE].set(bc)
    v_stack = jnp.concatenate([bp, bd, gd, betad, gr, betar, bc_pad], axis=0)
    assert v_stack.shape == (NV, HIDDEN_SIZE)

    return wp, w_stack, v_stack


def res_dnn_pallas(x, params):
    wp, w_stack, v_stack = pack_params(params)
    B = x.shape[0]

    # Single grid step at small batch (per-step overhead dominates this
    # kernel); cap tile rows at MAX_TM for very large batches.  Pad the batch
    # to a multiple of the row tile (zero rows are harmless: LayerNorm / tanh
    # are per-row) and slice back afterwards.
    TM = min(max(B, 8), MAX_TM)
    TM = ((TM + 7) // 8) * 8                 # sublane-aligned rows per step
    Bp = ((B + TM - 1) // TM) * TM
    if Bp != B:
        x = jnp.pad(x, ((0, Bp - B), (0, 0)))

    out = pl.pallas_call(
        res_dnn_kernel,
        out_shape=jax.ShapeDtypeStruct((Bp, HIDDEN_SIZE), jnp.float32),
        grid_spec=pltpu.PrefetchScalarGridSpec(
            num_scalar_prefetch=0,
            grid=(Bp // TM,),
            in_specs=[
                pl.BlockSpec((TM, INPUT_SIZE), lambda i: (i, 0)),            # x
                pl.BlockSpec((INPUT_SIZE, HIDDEN_SIZE), lambda i: (0, 0)),   # Wp
                pl.BlockSpec((NW, HIDDEN_SIZE, HIDDEN_SIZE),
                             lambda i: (0, 0, 0)),                           # weight stack
                pl.BlockSpec((NV, HIDDEN_SIZE), lambda i: (0, 0)),           # vector stack
            ],
            out_specs=pl.BlockSpec((TM, HIDDEN_SIZE), lambda i: (i, 0)),
        ),
        compiler_params=pltpu.CompilerParams(
            dimension_semantics=("parallel",)),
    )(x, wp, w_stack, v_stack)

    return out[:B, :OUTPUT_SIZE]


def res_dnn_reference(x, params):
    """Pure-JAX reference (same math as the PyTorch module) for a sanity check."""
    (wp, bp, wd, bd, gd, betad, gr, betar, wc, bc) = params
    h = x @ wp + bp[0]
    for r in range(NUM_RES_DNN):
        shortcut = h
        for d in range(NUM_DNN):
            l = r * NUM_DNN + d
            h = h @ wd[l] + bd[l]
            h = _layernorm(h, gd[l], betad[l])
            h = jnp.tanh(h)
        h = shortcut + h
        h = _layernorm(h, gr[r], betar[r])
        h = jnp.tanh(h)
    return h @ wc + bc[0]


def init_params(key):
    ks = jax.random.split(key, 8)
    scale_in = 1.0 / jnp.sqrt(INPUT_SIZE)
    scale_h  = 1.0 / jnp.sqrt(HIDDEN_SIZE)
    wp = jax.random.uniform(ks[0], (INPUT_SIZE, HIDDEN_SIZE), jnp.float32,
                            -scale_in, scale_in)
    bp = jax.random.uniform(ks[1], (1, HIDDEN_SIZE), jnp.float32, -scale_in, scale_in)
    wd = jax.random.uniform(ks[2], (NL, HIDDEN_SIZE, HIDDEN_SIZE), jnp.float32,
                            -scale_h, scale_h)
    bd = jax.random.uniform(ks[3], (NL, HIDDEN_SIZE), jnp.float32, -scale_h, scale_h)
    gd    = jnp.ones((NL, HIDDEN_SIZE), jnp.float32)      # LayerNorm init: gamma=1
    betad = jnp.zeros((NL, HIDDEN_SIZE), jnp.float32)     # LayerNorm init: beta=0
    gr    = jnp.ones((NUM_RES_DNN, HIDDEN_SIZE), jnp.float32)
    betar = jnp.zeros((NUM_RES_DNN, HIDDEN_SIZE), jnp.float32)
    wc = jax.random.uniform(ks[4], (HIDDEN_SIZE, OUTPUT_SIZE), jnp.float32,
                            -scale_h, scale_h)
    bc = jax.random.uniform(ks[5], (1, OUTPUT_SIZE), jnp.float32, -scale_h, scale_h)
    return (wp, bp, wd, bd, gd, betad, gr, betar, wc, bc)


if __name__ == "__main__":
    key = jax.random.PRNGKey(0)
    kx, kp = jax.random.split(key)
    x = jax.random.normal(kx, (BATCH, INPUT_SIZE), jnp.float32)
    params = init_params(kp)

    out = res_dnn_pallas(x, params)
    out = jax.block_until_ready(out)

    ref = res_dnn_reference(x, params)
    assert out.shape == (BATCH, OUTPUT_SIZE)
    assert jnp.max(jnp.abs(out - ref)) < 1e-4, "Pallas output mismatch vs reference"

    print("KERNEL_OK")
</pallas_src>

<mosaic_0001>
module attributes {stable_mosaic.version = 11 : i64} {
  func.func @res_dnn_kernel(%arg0: i32, %arg1: memref<16x16xf32, #tpu.memory_space<vmem>>, %arg2: memref<16x32xf32, #tpu.memory_space<vmem>>, %arg3: memref<5x32x32xf32, #tpu.memory_space<vmem>>, %arg4: memref<18x32xf32, #tpu.memory_space<vmem>>, %arg5: memref<16x32xf32, #tpu.memory_space<vmem>>) attributes {dimension_semantics = [#tpu.dimension_semantics<parallel>], iteration_bounds = array<i64: 1>, scalar_prefetch = 0 : i64, scratch_operands = 0 : i64, tpu.core_type = #tpu.core_type<tc>, window_params = [{transform_indices = @transform_0, window_bounds = array<i64: 16, 16>}, {pipeline_mode = #tpu.pipeline_mode<synchronous>, transform_indices = @transform_1, window_bounds = array<i64: 16, 32>}, {pipeline_mode = #tpu.pipeline_mode<synchronous>, transform_indices = @transform_2, window_bounds = array<i64: 5, 32, 32>}, {pipeline_mode = #tpu.pipeline_mode<synchronous>, transform_indices = @transform_3, window_bounds = array<i64: 18, 32>}, {transform_indices = @transform_4, window_bounds = array<i64: 16, 32>}]} {
    %c0 = arith.constant 0 : index
    %c0_0 = arith.constant 0 : index
    %0 = vector.load %arg4[%c0, %c0_0] : memref<18x32xf32, #tpu.memory_space<vmem>>, vector<18x32xf32>
    %c0_1 = arith.constant 0 : index
    %c0_2 = arith.constant 0 : index
    %1 = vector.load %arg1[%c0_1, %c0_2] : memref<16x16xf32, #tpu.memory_space<vmem>>, vector<16x16xf32>
    %c0_3 = arith.constant 0 : index
    %c0_4 = arith.constant 0 : index
    %2 = vector.load %arg2[%c0_3, %c0_4] : memref<16x32xf32, #tpu.memory_space<vmem>>, vector<16x32xf32>
    %cst = arith.constant dense<0.000000e+00> : vector<16x32xf32>
    %3 = tpu.matmul %1, %2, %cst {dimension_numbers = #tpu.dot_dimension_numbers<[1], [0], [0], [1], [0, 0, 1, 1], [], []>} : vector<16x16xf32>, vector<16x32xf32>, vector<16x32xf32> -> vector<16x32xf32>
    %4 = vector.extract_strided_slice %0 {offsets = [0, 0], sizes = [1, 32], strides = [1, 1]} : vector<18x32xf32> to vector<1x32xf32>
    %5 = vector.shape_cast %4 : vector<1x32xf32> to vector<32xf32>
    %6 = vector.shape_cast %5 : vector<32xf32> to vector<1x32xf32>
    %7 = vector.broadcast %6 : vector<1x32xf32> to vector<16x32xf32>
    %8 = arith.addf %3, %7 : vector<16x32xf32>
    %c0_5 = arith.constant 0 : index
    %c0_6 = arith.constant 0 : index
    %c0_7 = arith.constant 0 : index
    %9 = vector.load %arg3[%c0_5, %c0_6, %c0_7] : memref<5x32x32xf32, #tpu.memory_space<vmem>>, vector<1x32x32xf32>
    %10 = vector.shape_cast %9 : vector<1x32x32xf32> to vector<32x32xf32>
    %cst_8 = arith.constant dense<0.000000e+00> : vector<16x32xf32>
    %11 = tpu.matmul %8, %10, %cst_8 {dimension_numbers = #tpu.dot_dimension_numbers<[1], [0], [0], [1], [0, 0, 1, 1], [], []>} : vector<16x32xf32>, vector<32x32xf32>, vector<16x32xf32> -> vector<16x32xf32>
    %12 = vector.extract_strided_slice %0 {offsets = [1, 0], sizes = [1, 32], strides = [1, 1]} : vector<18x32xf32> to vector<1x32xf32>
    %13 = vector.shape_cast %12 : vector<1x32xf32> to vector<32xf32>
    %14 = vector.shape_cast %13 : vector<32xf32> to vector<1x32xf32>
    %15 = vector.broadcast %14 : vector<1x32xf32> to vector<16x32xf32>
    %16 = arith.addf %11, %15 : vector<16x32xf32>
    %17 = vector.extract_strided_slice %0 {offsets = [5, 0], sizes = [1, 32], strides = [1, 1]} : vector<18x32xf32> to vector<1x32xf32>
    %18 = vector.shape_cast %17 : vector<1x32xf32> to vector<32xf32>
    %19 = vector.extract_strided_slice %0 {offsets = [9, 0], sizes = [1, 32], strides = [1, 1]} : vector<18x32xf32> to vector<1x32xf32>
    %20 = vector.shape_cast %19 : vector<1x32xf32> to vector<32xf32>
    %cst_9 = arith.constant dense<0.000000e+00> : vector<16xf32>
    %21 = vector.multi_reduction <add>, %16, %cst_9 [1] : vector<16x32xf32> to vector<16xf32>
    %22 = vector.shape_cast %21 : vector<16xf32> to vector<16x1xf32>
    %cst_10 = arith.constant 3.200000e+01 : f32
    %23 = vector.broadcast %cst_10 : f32 to vector<16x1xf32>
    %24 = arith.divf %22, %23 : vector<16x1xf32>
    %25 = vector.broadcast %24 : vector<16x1xf32> to vector<16x32xf32>
    %26 = arith.subf %16, %25 : vector<16x32xf32>
    %27 = arith.mulf %26, %26 : vector<16x32xf32>
    %cst_11 = arith.constant dense<0.000000e+00> : vector<16xf32>
    %28 = vector.multi_reduction <add>, %27, %cst_11 [1] : vector<16x32xf32> to vector<16xf32>
    %29 = vector.shape_cast %28 : vector<16xf32> to vector<16x1xf32>
    %cst_12 = arith.constant 3.200000e+01 : f32
    %30 = vector.broadcast %cst_12 : f32 to vector<16x1xf32>
    %31 = arith.divf %29, %30 : vector<16x1xf32>
    %32 = vector.broadcast %24 : vector<16x1xf32> to vector<16x32xf32>
    %33 = arith.subf %16, %32 : vector<16x32xf32>
    %cst_13 = arith.constant 9.99999974E-6 : f32
    %34 = vector.broadcast %cst_13 : f32 to vector<16x1xf32>
    %35 = arith.addf %31, %34 : vector<16x1xf32>
    %36 = math.rsqrt %35 : vector<16x1xf32>
    %37 = vector.broadcast %36 : vector<16x1xf32> to vector<16x32xf32>
    %38 = arith.mulf %33, %37 : vector<16x32xf32>
    %39 = vector.shape_cast %18 : vector<32xf32> to vector<1x32xf32>
    %40 = vector.broadcast %39 : vector<1x32xf32> to vector<16x32xf32>
    %41 = arith.mulf %38, %40 : vector<16x32xf32>
    %42 = vector.shape_cast %20 : vector<32xf32> to vector<1x32xf32>
    %43 = vector.broadcast %42 : vector<1x32xf32> to vector<16x32xf32>
    %44 = arith.addf %41, %43 : vector<16x32xf32>
    %45 = math.tanh %44 : vector<16x32xf32>
    %c1 = arith.constant 1 : index
    %c0_14 = arith.constant 0 : index
    %c0_15 = arith.constant 0 : index
    %46 = vector.load %arg3[%c1, %c0_14, %c0_15] : memref<5x32x32xf32, #tpu.memory_space<vmem>>, vector<1x32x32xf32>
    %47 = vector.shape_cast %46 : vector<1x32x32xf32> to vector<32x32xf32>
    %cst_16 = arith.constant dense<0.000000e+00> : vector<16x32xf32>
    %48 = tpu.matmul %45, %47, %cst_16 {dimension_numbers = #tpu.dot_dimension_numbers<[1], [0], [0], [1], [0, 0, 1, 1], [], []>} : vector<16x32xf32>, vector<32x32xf32>, vector<16x32xf32> -> vector<16x32xf32>
    %49 = vector.extract_strided_slice %0 {offsets = [2, 0], sizes = [1, 32], strides = [1, 1]} : vector<18x32xf32> to vector<1x32xf32>
    %50 = vector.shape_cast %49 : vector<1x32xf32> to vector<32xf32>
    %51 = vector.shape_cast %50 : vector<32xf32> to vector<1x32xf32>
    %52 = vector.broadcast %51 : vector<1x32xf32> to vector<16x32xf32>
    %53 = arith.addf %48, %52 : vector<16x32xf32>
    %54 = vector.extract_strided_slice %0 {offsets = [6, 0], sizes = [1, 32], strides = [1, 1]} : vector<18x32xf32> to vector<1x32xf32>
    %55 = vector.shape_cast %54 : vector<1x32xf32> to vector<32xf32>
    %56 = vector.extract_strided_slice %0 {offsets = [10, 0], sizes = [1, 32], strides = [1, 1]} : vector<18x32xf32> to vector<1x32xf32>
    %57 = vector.shape_cast %56 : vector<1x32xf32> to vector<32xf32>
    %cst_17 = arith.constant dense<0.000000e+00> : vector<16xf32>
    %58 = vector.multi_reduction <add>, %53, %cst_17 [1] : vector<16x32xf32> to vector<16xf32>
    %59 = vector.shape_cast %58 : vector<16xf32> to vector<16x1xf32>
    %cst_18 = arith.constant 3.200000e+01 : f32
    %60 = vector.broadcast %cst_18 : f32 to vector<16x1xf32>
    %61 = arith.divf %59, %60 : vector<16x1xf32>
    %62 = vector.broadcast %61 : vector<16x1xf32> to vector<16x32xf32>
    %63 = arith.subf %53, %62 : vector<16x32xf32>
    %64 = arith.mulf %63, %63 : vector<16x32xf32>
    %cst_19 = arith.constant dense<0.000000e+00> : vector<16xf32>
    %65 = vector.multi_reduction <add>, %64, %cst_19 [1] : vector<16x32xf32> to vector<16xf32>
    %66 = vector.shape_cast %65 : vector<16xf32> to vector<16x1xf32>
    %cst_20 = arith.constant 3.200000e+01 : f32
    %67 = vector.broadcast %cst_20 : f32 to vector<16x1xf32>
    %68 = arith.divf %66, %67 : vector<16x1xf32>
    %69 = vector.broadcast %61 : vector<16x1xf32> to vector<16x32xf32>
    %70 = arith.subf %53, %69 : vector<16x32xf32>
    %cst_21 = arith.constant 9.99999974E-6 : f32
    %71 = vector.broadcast %cst_21 : f32 to vector<16x1xf32>
    %72 = arith.addf %68, %71 : vector<16x1xf32>
    %73 = math.rsqrt %72 : vector<16x1xf32>
    %74 = vector.broadcast %73 : vector<16x1xf32> to vector<16x32xf32>
    %75 = arith.mulf %70, %74 : vector<16x32xf32>
    %76 = vector.shape_cast %55 : vector<32xf32> to vector<1x32xf32>
    %77 = vector.broadcast %76 : vector<1x32xf32> to vector<16x32xf32>
    %78 = arith.mulf %75, %77 : vector<16x32xf32>
    %79 = vector.shape_cast %57 : vector<32xf32> to vector<1x32xf32>
    %80 = vector.broadcast %79 : vector<1x32xf32> to vector<16x32xf32>
    %81 = arith.addf %78, %80 : vector<16x32xf32>
    %82 = math.tanh %81 : vector<16x32xf32>
    %83 = arith.addf %8, %82 : vector<16x32xf32>
    %84 = vector.extract_strided_slice %0 {offsets = [13, 0], sizes = [1, 32], strides = [1, 1]} : vector<18x32xf32> to vector<1x32xf32>
    %85 = vector.shape_cast %84 : vector<1x32xf32> to vector<32xf32>
    %86 = vector.extract_strided_slice %0 {offsets = [15, 0], sizes = [1, 32], strides = [1, 1]} : vector<18x32xf32> to vector<1x32xf32>
    %87 = vector.shape_cast %86 : vector<1x32xf32> to vector<32xf32>
    %cst_22 = arith.constant dense<0.000000e+00> : vector<16xf32>
    %88 = vector.multi_reduction <add>, %83, %cst_22 [1] : vector<16x32xf32> to vector<16xf32>
    %89 = vector.shape_cast %88 : vector<16xf32> to vector<16x1xf32>
    %cst_23 = arith.constant 3.200000e+01 : f32
    %90 = vector.broadcast %cst_23 : f32 to vector<16x1xf32>
    %91 = arith.divf %89, %90 : vector<16x1xf32>
    %92 = vector.broadcast %91 : vector<16x1xf32> to vector<16x32xf32>
    %93 = arith.subf %83, %92 : vector<16x32xf32>
    %94 = arith.mulf %93, %93 : vector<16x32xf32>
    %cst_24 = arith.constant dense<0.000000e+00> : vector<16xf32>
    %95 = vector.multi_reduction <add>, %94, %cst_24 [1] : vector<16x32xf32> to vector<16xf32>
    %96 = vector.shape_cast %95 : vector<16xf32> to vector<16x1xf32>
    %cst_25 = arith.constant 3.200000e+01 : f32
    %97 = vector.broadcast %cst_25 : f32 to vector<16x1xf32>
    %98 = arith.divf %96, %97 : vector<16x1xf32>
    %99 = vector.broadcast %91 : vector<16x1xf32> to vector<16x32xf32>
    %100 = arith.subf %83, %99 : vector<16x32xf32>
    %cst_26 = arith.constant 9.99999974E-6 : f32
    %101 = vector.broadcast %cst_26 : f32 to vector<16x1xf32>
    %102 = arith.addf %98, %101 : vector<16x1xf32>
    %103 = math.rsqrt %102 : vector<16x1xf32>
    %104 = vector.broadcast %103 : vector<16x1xf32> to vector<16x32xf32>
    %105 = arith.mulf %100, %104 : vector<16x32xf32>
    %106 = vector.shape_cast %85 : vector<32xf32> to vector<1x32xf32>
    %107 = vector.broadcast %106 : vector<1x32xf32> to vector<16x32xf32>
    %108 = arith.mulf %105, %107 : vector<16x32xf32>
    %109 = vector.shape_cast %87 : vector<32xf32> to vector<1x32xf32>
    %110 = vector.broadcast %109 : vector<1x32xf32> to vector<16x32xf32>
    %111 = arith.addf %108, %110 : vector<16x32xf32>
    %112 = math.tanh %111 : vector<16x32xf32>
    %c2 = arith.constant 2 : index
    %c0_27 = arith.constant 0 : index
    %c0_28 = arith.constant 0 : index
    %113 = vector.load %arg3[%c2, %c0_27, %c0_28] : memref<5x32x32xf32, #tpu.memory_space<vmem>>, vector<1x32x32xf32>
    %114 = vector.shape_cast %113 : vector<1x32x32xf32> to vector<32x32xf32>
    %cst_29 = arith.constant dense<0.000000e+00> : vector<16x32xf32>
    %115 = tpu.matmul %112, %114, %cst_29 {dimension_numbers = #tpu.dot_dimension_numbers<[1], [0], [0], [1], [0, 0, 1, 1], [], []>} : vector<16x32xf32>, vector<32x32xf32>, vector<16x32xf32> -> vector<16x32xf32>
    %116 = vector.extract_strided_slice %0 {offsets = [3, 0], sizes = [1, 32], strides = [1, 1]} : vector<18x32xf32> to vector<1x32xf32>
    %117 = vector.shape_cast %116 : vector<1x32xf32> to vector<32xf32>
    %118 = vector.shape_cast %117 : vector<32xf32> to vector<1x32xf32>
    %119 = vector.broadcast %118 : vector<1x32xf32> to vector<16x32xf32>
    %120 = arith.addf %115, %119 : vector<16x32xf32>
    %121 = vector.extract_strided_slice %0 {offsets = [7, 0], sizes = [1, 32], strides = [1, 1]} : vector<18x32xf32> to vector<1x32xf32>
    %122 = vector.shape_cast %121 : vector<1x32xf32> to vector<32xf32>
    %123 = vector.extract_strided_slice %0 {offsets = [11, 0], sizes = [1, 32], strides = [1, 1]} : vector<18x32xf32> to vector<1x32xf32>
    %124 = vector.shape_cast %123 : vector<1x32xf32> to vector<32xf32>
    %cst_30 = arith.constant dense<0.000000e+00> : vector<16xf32>
    %125 = vector.multi_reduction <add>, %120, %cst_30 [1] : vector<16x32xf32> to vector<16xf32>
    %126 = vector.shape_cast %125 : vector<16xf32> to vector<16x1xf32>
    %cst_31 = arith.constant 3.200000e+01 : f32
    %127 = vector.broadcast %cst_31 : f32 to vector<16x1xf32>
    %128 = arith.divf %126, %127 : vector<16x1xf32>
    %129 = vector.broadcast %128 : vector<16x1xf32> to vector<16x32xf32>
    %130 = arith.subf %120, %129 : vector<16x32xf32>
    %131 = arith.mulf %130, %130 : vector<16x32xf32>
    %cst_32 = arith.constant dense<0.000000e+00> : vector<16xf32>
    %132 = vector.multi_reduction <add>, %131, %cst_32 [1] : vector<16x32xf32> to vector<16xf32>
    %133 = vector.shape_cast %132 : vector<16xf32> to vector<16x1xf32>
    %cst_33 = arith.constant 3.200000e+01 : f32
    %134 = vector.broadcast %cst_33 : f32 to vector<16x1xf32>
    %135 = arith.divf %133, %134 : vector<16x1xf32>
    %136 = vector.broadcast %128 : vector<16x1xf32> to vector<16x32xf32>
    %137 = arith.subf %120, %136 : vector<16x32xf32>
    %cst_34 = arith.constant 9.99999974E-6 : f32
    %138 = vector.broadcast %cst_34 : f32 to vector<16x1xf32>
    %139 = arith.addf %135, %138 : vector<16x1xf32>
    %140 = math.rsqrt %139 : vector<16x1xf32>
    %141 = vector.broadcast %140 : vector<16x1xf32> to vector<16x32xf32>
    %142 = arith.mulf %137, %141 : vector<16x32xf32>
    %143 = vector.shape_cast %122 : vector<32xf32> to vector<1x32xf32>
    %144 = vector.broadcast %143 : vector<1x32xf32> to vector<16x32xf32>
    %145 = arith.mulf %142, %144 : vector<16x32xf32>
    %146 = vector.shape_cast %124 : vector<32xf32> to vector<1x32xf32>
    %147 = vector.broadcast %146 : vector<1x32xf32> to vector<16x32xf32>
    %148 = arith.addf %145, %147 : vector<16x32xf32>
    %149 = math.tanh %148 : vector<16x32xf32>
    %c3 = arith.constant 3 : index
    %c0_35 = arith.constant 0 : index
    %c0_36 = arith.constant 0 : index
    %150 = vector.load %arg3[%c3, %c0_35, %c0_36] : memref<5x32x32xf32, #tpu.memory_space<vmem>>, vector<1x32x32xf32>
    %151 = vector.shape_cast %150 : vector<1x32x32xf32> to vector<32x32xf32>
    %cst_37 = arith.constant dense<0.000000e+00> : vector<16x32xf32>
    %152 = tpu.matmul %149, %151, %cst_37 {dimension_numbers = #tpu.dot_dimension_numbers<[1], [0], [0], [1], [0, 0, 1, 1], [], []>} : vector<16x32xf32>, vector<32x32xf32>, vector<16x32xf32> -> vector<16x32xf32>
    %153 = vector.extract_strided_slice %0 {offsets = [4, 0], sizes = [1, 32], strides = [1, 1]} : vector<18x32xf32> to vector<1x32xf32>
    %154 = vector.shape_cast %153 : vector<1x32xf32> to vector<32xf32>
    %155 = vector.shape_cast %154 : vector<32xf32> to vector<1x32xf32>
    %156 = vector.broadcast %155 : vector<1x32xf32> to vector<16x32xf32>
    %157 = arith.addf %152, %156 : vector<16x32xf32>
    %158 = vector.extract_strided_slice %0 {offsets = [8, 0], sizes = [1, 32], strides = [1, 1]} : vector<18x32xf32> to vector<1x32xf32>
    %159 = vector.shape_cast %158 : vector<1x32xf32> to vector<32xf32>
    %160 = vector.extract_strided_slice %0 {offsets = [12, 0], sizes = [1, 32], strides = [1, 1]} : vector<18x32xf32> to vector<1x32xf32>
    %161 = vector.shape_cast %160 : vector<1x32xf32> to vector<32xf32>
    %cst_38 = arith.constant dense<0.000000e+00> : vector<16xf32>
    %162 = vector.multi_reduction <add>, %157, %cst_38 [1] : vector<16x32xf32> to vector<16xf32>
    %163 = vector.shape_cast %162 : vector<16xf32> to vector<16x1xf32>
    %cst_39 = arith.constant 3.200000e+01 : f32
    %164 = vector.broadcast %cst_39 : f32 to vector<16x1xf32>
    %165 = arith.divf %163, %164 : vector<16x1xf32>
    %166 = vector.broadcast %165 : vector<16x1xf32> to vector<16x32xf32>
    %167 = arith.subf %157, %166 : vector<16x32xf32>
    %168 = arith.mulf %167, %167 : vector<16x32xf32>
    %cst_40 = arith.constant dense<0.000000e+00> : vector<16xf32>
    %169 = vector.multi_reduction <add>, %168, %cst_40 [1] : vector<16x32xf32> to vector<16xf32>
    %170 = vector.shape_cast %169 : vector<16xf32> to vector<16x1xf32>
    %cst_41 = arith.constant 3.200000e+01 : f32
    %171 = vector.broadcast %cst_41 : f32 to vector<16x1xf32>
    %172 = arith.divf %170, %171 : vector<16x1xf32>
    %173 = vector.broadcast %165 : vector<16x1xf32> to vector<16x32xf32>
    %174 = arith.subf %157, %173 : vector<16x32xf32>
    %cst_42 = arith.constant 9.99999974E-6 : f32
    %175 = vector.broadcast %cst_42 : f32 to vector<16x1xf32>
    %176 = arith.addf %172, %175 : vector<16x1xf32>
    %177 = math.rsqrt %176 : vector<16x1xf32>
    %178 = vector.broadcast %177 : vector<16x1xf32> to vector<16x32xf32>
    %179 = arith.mulf %174, %178 : vector<16x32xf32>
    %180 = vector.shape_cast %159 : vector<32xf32> to vector<1x32xf32>
    %181 = vector.broadcast %180 : vector<1x32xf32> to vector<16x32xf32>
    %182 = arith.mulf %179, %181 : vector<16x32xf32>
    %183 = vector.shape_cast %161 : vector<32xf32> to vector<1x32xf32>
    %184 = vector.broadcast %183 : vector<1x32xf32> to vector<16x32xf32>
    %185 = arith.addf %182, %184 : vector<16x32xf32>
    %186 = math.tanh %185 : vector<16x32xf32>
    %187 = arith.addf %112, %186 : vector<16x32xf32>
    %188 = vector.extract_strided_slice %0 {offsets = [14, 0], sizes = [1, 32], strides = [1, 1]} : vector<18x32xf32> to vector<1x32xf32>
    %189 = vector.shape_cast %188 : vector<1x32xf32> to vector<32xf32>
    %190 = vector.extract_strided_slice %0 {offsets = [16, 0], sizes = [1, 32], strides = [1, 1]} : vector<18x32xf32> to vector<1x32xf32>
    %191 = vector.shape_cast %190 : vector<1x32xf32> to vector<32xf32>
    %cst_43 = arith.constant dense<0.000000e+00> : vector<16xf32>
    %192 = vector.multi_reduction <add>, %187, %cst_43 [1] : vector<16x32xf32> to vector<16xf32>
    %193 = vector.shape_cast %192 : vector<16xf32> to vector<16x1xf32>
    %cst_44 = arith.constant 3.200000e+01 : f32
    %194 = vector.broadcast %cst_44 : f32 to vector<16x1xf32>
    %195 = arith.divf %193, %194 : vector<16x1xf32>
    %196 = vector.broadcast %195 : vector<16x1xf32> to vector<16x32xf32>
    %197 = arith.subf %187, %196 : vector<16x32xf32>
    %198 = arith.mulf %197, %197 : vector<16x32xf32>
    %cst_45 = arith.constant dense<0.000000e+00> : vector<16xf32>
    %199 = vector.multi_reduction <add>, %198, %cst_45 [1] : vector<16x32xf32> to vector<16xf32>
    %200 = vector.shape_cast %199 : vector<16xf32> to vector<16x1xf32>
    %cst_46 = arith.constant 3.200000e+01 : f32
    %201 = vector.broadcast %cst_46 : f32 to vector<16x1xf32>
    %202 = arith.divf %200, %201 : vector<16x1xf32>
    %203 = vector.broadcast %195 : vector<16x1xf32> to vector<16x32xf32>
    %204 = arith.subf %187, %203 : vector<16x32xf32>
    %cst_47 = arith.constant 9.99999974E-6 : f32
    %205 = vector.broadcast %cst_47 : f32 to vector<16x1xf32>
    %206 = arith.addf %202, %205 : vector<16x1xf32>
    %207 = math.rsqrt %206 : vector<16x1xf32>
    %208 = vector.broadcast %207 : vector<16x1xf32> to vector<16x32xf32>
    %209 = arith.mulf %204, %208 : vector<16x32xf32>
    %210 = vector.shape_cast %189 : vector<32xf32> to vector<1x32xf32>
    %211 = vector.broadcast %210 : vector<1x32xf32> to vector<16x32xf32>
    %212 = arith.mulf %209, %211 : vector<16x32xf32>
    %213 = vector.shape_cast %191 : vector<32xf32> to vector<1x32xf32>
    %214 = vector.broadcast %213 : vector<1x32xf32> to vector<16x32xf32>
    %215 = arith.addf %212, %214 : vector<16x32xf32>
    %216 = math.tanh %215 : vector<16x32xf32>
    %c4 = arith.constant 4 : index
    %c0_48 = arith.constant 0 : index
    %c0_49 = arith.constant 0 : index
    %217 = vector.load %arg3[%c4, %c0_48, %c0_49] : memref<5x32x32xf32, #tpu.memory_space<vmem>>, vector<1x32x32xf32>
    %218 = vector.shape_cast %217 : vector<1x32x32xf32> to vector<32x32xf32>
    %cst_50 = arith.constant dense<0.000000e+00> : vector<16x32xf32>
    %219 = tpu.matmul %216, %218, %cst_50 {dimension_numbers = #tpu.dot_dimension_numbers<[1], [0], [0], [1], [0, 0, 1, 1], [], []>} : vector<16x32xf32>, vector<32x32xf32>, vector<16x32xf32> -> vector<16x32xf32>
    %220 = vector.extract_strided_slice %0 {offsets = [17, 0], sizes = [1, 32], strides = [1, 1]} : vector<18x32xf32> to vector<1x32xf32>
    %221 = vector.shape_cast %220 : vector<1x32xf32> to vector<32xf32>
    %222 = vector.shape_cast %221 : vector<32xf32> to vector<1x32xf32>
    %223 = vector.broadcast %222 : vector<1x32xf32> to vector<16x32xf32>
    %224 = arith.addf %219, %223 : vector<16x32xf32>
    %c0_51 = arith.constant 0 : index
    %c0_52 = arith.constant 0 : index
    %225 = vector.load %arg5[%c0_51, %c0_52] : memref<16x32xf32, #tpu.memory_space<vmem>>, vector<16x32xf32>
    tpu.vector_store %arg5[%c0_51, %c0_52], %224 {strides = array<i32>} : memref<16x32xf32, #tpu.memory_space<vmem>>, vector<16x32xf32>,
    return
  }
  func.func @transform_0(%arg0: i32) -> (i32, i32) {
    %c0_i32 = arith.constant 0 : i32
    %c0_i32_0 = arith.constant 0 : i32
    return %arg0, %c0_i32 : i32, i32
  }
  func.func @transform_1(%arg0: i32) -> (i32, i32) {
    %c0_i32 = arith.constant 0 : i32
    %c0_i32_0 = arith.constant 0 : i32
    %c0_i32_1 = arith.constant 0 : i32
    return %c0_i32, %c0_i32_0 : i32, i32
  }
  func.func @transform_2(%arg0: i32) -> (i32, i32, i32) {
    %c0_i32 = arith.constant 0 : i32
    %c0_i32_0 = arith.constant 0 : i32
    %c0_i32_1 = arith.constant 0 : i32
    %c0_i32_2 = arith.constant 0 : i32
    return %c0_i32, %c0_i32_0, %c0_i32_1 : i32, i32, i32
  }
  func.func @transform_3(%arg0: i32) -> (i32, i32) {
    %c0_i32 = arith.constant 0 : i32
    %c0_i32_0 = arith.constant 0 : i32
    %c0_i32_1 = arith.constant 0 : i32
    return %c0_i32, %c0_i32_0 : i32, i32
  }
  func.func @transform_4(%arg0: i32) -> (i32, i32) {
    %c0_i32 = arith.constant 0 : i32
    %c0_i32_0 = arith.constant 0 : i32
    return %arg0, %c0_i32 : i32, i32
  }
}

</mosaic_0001>

<bundles_post_ra>
// kernel: tpu_custom_call.1
= control target key start
LH: loop header
LB: loop body
LE: loop exit
PB: predicated region body
PF: predicated region fallthrough
CT: control target
= control target key end

     0   :  { %9 = vsyncpa [#allocation3], 0  ;;  %s1428_s0 = inlined_call_operand.hbm [shape: f32[16,16], index: 0, kind: input, shape index: {}]   ;;  %s1429_s1 = inlined_call_operand.hbm [shape: f32[16,32], index: 1, kind: input, shape index: {}]   ;;  %s1430_s2 = inlined_call_operand.hbm [shape: f32[5,32,32], index: 2, kind: input, shape index: {}]   ;;  %s1431_s3 = inlined_call_operand.hbm [shape: f32[18,32], index: 3, kind: input, shape index: {}]   ;;  %s1432_s4 = inlined_call_operand.hbm [shape: f32[16,32], index: 4, kind: output, shape index: {}]  }
   0x1   :  { %10 = vsyncpa [#allocation6], 0 }
   0x2   :  { %11 = vsyncpa [#allocation9], 0 }
   0x3   :  { %12 = vsyncpa [#allocation4], 0  ;;  %s1207_s15 = smov [#allocation5]   ;;  %s1208_s17 = smov [#allocation2]  }
   0x4   :  { %s30_s16 = sshll.u32 %s1207_s15, 4  ;;  %s18_s18 = sshll.u32 %s1208_s17, 4  ;;  %s31_s16 = int_to_ptr.vmem [resolvable:$true] %s30_s16  ;;  %s1239_s18 = int_to_ptr.vmem [resolvable:$true] %s18_s18 }
   0x5   :  { %s1089_s21 = scalar_lea.hbm %s1429_s1, 256 }
   0x6   :  { %p1090_p0 = scmp.ne.s32.totalorder %s1429_s1, %s1089_s21  ;;  %p1093_p1 = scmp.lt.u32.totalorder %s1089_s21, %s1429_s1 }
   0x8   :  { %p1095_p2 = pnand %p1093_p1, %p1090_p0 }
   0xa   :  { %1098 = shalt.err (!%p1095_p2)
}
   0xb   :  { %s1099_s26 = scalar_lea.vmem %s31_s16, 256  ;;  %p1104_p4 = scmp.lt.s32.totalorder %s31_s16, %s31_s16 }
   0xc   :  { %p1100_p3 = scmp.ne.s32.totalorder %s31_s16, %s1099_s26  ;;  %p1105_p5 = scmp.lt.s32.totalorder %s1099_s26, %s1099_s26 }
   0xe   :  { %p1106_p6 = por %p1105_p5, %p1104_p4 }
  0x10   :  { %p1107_p7 = pnand %p1106_p6, %p1100_p3 }
  0x12   :  { %1110 = shalt.err (!%p1107_p7)
}
  0x13   :  { %s1209_s27 = smov 128   ;;  %s1210_s28 = smov 8  }
  0x14   :  { %36 = dma.hbm_to_vmem [thread:$0]  %s1429_s1, 256, %s31_s16, [#allocation6], %s1209_s27, %s1209_s27, %s1210_s28  }
  0x15   :  { %s1111_s7 = scalar_lea.hbm %s1428_s0, 256 }
  0x16   :  { %p1112_p8 = scmp.ne.s32.totalorder %s1428_s0, %s1111_s7  ;;  %p1115_p9 = scmp.lt.u32.totalorder %s1111_s7, %s1428_s0 }
  0x18   :  { %p1117_p10 = pnand %p1115_p9, %p1112_p8 }
  0x1a   :  { %1120 = shalt.err (!%p1117_p10)
}
  0x1b   :  { %s1121_s12 = scalar_lea.vmem %s1239_s18, 256  ;;  %p1126_p12 = scmp.lt.s32.totalorder %s1239_s18, %s1239_s18 }
  0x1c   :  { %p1122_p11 = scmp.ne.s32.totalorder %s1239_s18, %s1121_s12  ;;  %p1127_p13 = scmp.lt.s32.totalorder %s1121_s12, %s1121_s12 }
  0x1e   :  { %p1128_p0 = por %p1127_p13, %p1126_p12 }
  0x20   :  { %p1129_p1 = pnand %p1128_p0, %p1122_p11 }
  0x22   :  { %1132 = shalt.err (!%p1129_p1)
}
  0x23   :  { %24 = dma.hbm_to_vmem [thread:$0]  %s1428_s0, 256, %s1239_s18, [#allocation3], %s1209_s27, %s1209_s27, %s1210_s28  }
  0x24   :  { %s1211_s14 = smov [#allocation7]   ;;  %s1212_s16 = smov [#allocation8]  }
  0x25   :  { %s42_s15 = sshll.u32 %s1211_s14, 4  ;;  %s54_s17 = sshll.u32 %s1212_s16, 4  ;;  %s43_s15 = int_to_ptr.vmem [resolvable:$true] %s42_s15  ;;  %s1276_s17 = int_to_ptr.vmem [resolvable:$true] %s54_s17 }
  0x26   :  { %s1133_s21 = scalar_lea.hbm %s1430_s2, 2560 }
  0x27   :  { %p1134_p2 = scmp.ne.s32.totalorder %s1430_s2, %s1133_s21  ;;  %p1137_p3 = scmp.lt.u32.totalorder %s1133_s21, %s1430_s2 }
  0x29   :  { %p1139_p4 = pnand %p1137_p3, %p1134_p2 }
  0x2b   :  { %1142 = shalt.err (!%p1139_p4)
}
  0x2c   :  { %s1143_s0 = scalar_lea.vmem %s43_s15, 2560  ;;  %p1148_p6 = scmp.lt.s32.totalorder %s43_s15, %s43_s15 }
  0x2d   :  { %p1144_p5 = scmp.ne.s32.totalorder %s43_s15, %s1143_s0  ;;  %p1149_p7 = scmp.lt.s32.totalorder %s1143_s0, %s1143_s0 }
  0x2f   :  { %p1150_p8 = por %p1149_p7, %p1148_p6 }
  0x31   :  { %p1151_p9 = pnand %p1150_p8, %p1144_p5 }
  0x33   :  { %1154 = shalt.err (!%p1151_p9)
}
  0x34   :  { %48 = dma.hbm_to_vmem [thread:$0]  %s1430_s2, 2560, %s43_s15, [#allocation6], %s1209_s27, %s1209_s27, %s1210_s28  }
  0x35   :  { %s1155_s5 = scalar_lea.hbm %s1431_s3, 384 }
  0x36   :  { %p1156_p10 = scmp.ne.s32.totalorder %s1431_s3, %s1155_s5  ;;  %p1159_p11 = scmp.lt.u32.totalorder %s1155_s5, %s1431_s3 }
  0x38   :  { %p1161_p12 = pnand %p1159_p11, %p1156_p10 }
  0x3a   :  { %1164 = shalt.err (!%p1161_p12)
}
  0x3b   :  { %s1165_s10 = scalar_lea.vmem %s1276_s17, 384  ;;  %p1170_p0 = scmp.lt.s32.totalorder %s1276_s17, %s1276_s17 }
  0x3c   :  { %p1166_p13 = scmp.ne.s32.totalorder %s1276_s17, %s1165_s10  ;;  %p1171_p1 = scmp.lt.s32.totalorder %s1165_s10, %s1165_s10 }
  0x3e   :  { %p1172_p2 = por %p1171_p1, %p1170_p0 }
  0x40   :  { %p1173_p3 = pnand %p1172_p2, %p1166_p13 }
  0x42   :  { %1176 = shalt.err (!%p1173_p3)
}
  0x43   :  { %60 = dma.hbm_to_vmem [thread:$0]  %s1431_s3, 384, %s1276_s17, [#allocation9], %s1209_s27, %s1209_s27, %s1210_s28  }
  0x44   :  { %1199 = dma.done.wait [#allocation3], 256  }
  0x45   :  { %1200 = vsyncadd [#allocation3], 4294967040 }
  0x46   :  { %1201 = dma.done.wait [#allocation6], 2816  }
  0x47   :  { %1202 = vsyncadd [#allocation6], 4294964480 }
  0x48   :  { %1203 = dma.done.wait [#allocation9], 384  }
  0x49   :  { %1204 = vsyncadd [#allocation9], 4294966912  ;;  %vm84_vm0 = vcmask 130048   ;;  %v78_v0 = vld [vmem:[#allocation5] sm:$0xff]  ;;  %v79_v1 = vld [vmem:[#allocation5 + $0x8] sm:$0xff]  ;;  %v80_v11 = vlaneseq  ;;  %vm174_vm1 = vcmask 261120  }
  0x4a   :  { %v76_v2 = vld [vmem:[#allocation2] sm:$0xff]  ;;  %v990_v3 = vpack.c.bf16 %v79_v1, %v78_v0  ;;  %v167_v5 = vld [vmem:[#allocation7 + $0x8] sm:$0xff]  ;;  %v168_v8 = vld [vmem:[#allocation7 + $0x10] sm:$0xff]  ;;  %s1213_s3 = smov [#allocation10]  }
  0x4b   :  { %932 = vmatprep.mubr.msk.f32.mxu0 %vm84_vm0, %v76_v2  ;;  %v166_v4 = vld [vmem:[#allocation7] sm:$0xff]  ;;  %v77_v7 = vld [vmem:[#allocation2 + $0x8] sm:$0xff]  ;;  %v169_v9 = vld [vmem:[#allocation7 + $0x18] sm:$0xff]  ;;  %v1313_v12 = vshrl.u32 %v80_v11, 7  ;;  %s868_s12 = sshll.u32 %s1213_s3, 4  ;;  %s869_s12 = int_to_ptr.vmem [resolvable:$true] %s868_s12 }
  0x4c   :  { %v994_v6 = vpack.c.bf16 %v167_v5, %v166_v4  ;;  %991 = vmatprep.subr.bf16.mxu0 %v990_v3  ;;  %v998_v10 = vpack.c.bf16 %v169_v9, %v168_v8  ;;  %v1318_v14 = vld [vmem:[#allocation8] sm:$0xff]  ;;  %v299_v39 = vld [vmem:[#allocation7 + $0x28] sm:$0xff]  ;;  %v300_v40 = vld [vmem:[#allocation7 + $0x30] sm:$0xff]  ;;  %s1177_s1 = scalar_lea.vmem %s869_s12, 256  ;;  %p1182_p5 = scmp.lt.s32.totalorder %s869_s12, %s869_s12 }
  0x4d   :  { %993 = vmatpush3.bf16.msra.mxu0 %v990_v3  ;;  %v1316_v13 = vsub.s32 0, %v1313_v12  ;;  %v1331_v20 = vsub.s32 1, %v1313_v12  ;;  %v298_v38 = vld [vmem:[#allocation7 + $0x20] sm:$0xff]  ;;  %v301_v42 = vld [vmem:[#allocation7 + $0x38] sm:$0xff]  ;;  %v285_v50 = vsub.s32 5, %v1313_v12  ;;  %v1340_v51 = vld [vmem:[#allocation8 + $0x8] sm:$0xff]  ;;  %p1178_p4 = scmp.ne.s32.totalorder %s869_s12, %s1177_s1  ;;  %p1183_p6 = scmp.lt.s32.totalorder %s1177_s1, %s1177_s1 }
  0x4e   :  { %995 = vmatprep.subr.bf16.mxu1 %v994_v6  ;;  %v1002_v41 = vpack.c.bf16 %v299_v39, %v298_v38  ;;  %v1006_v43 = vpack.c.bf16 %v301_v42, %v300_v40  ;;  %v304_v0 = vsub.s32 2, %v1313_v12 }
  0x4f   :  { %997 = vmatpush3.bf16.msra.mxu1 %v994_v6  ;;  %v83_v15 = vrot.slane %v1318_v14, %v1316_v13  ;;  %v173_v21 = vrot.slane %v1318_v14, %v1331_v20  ;;  %v286_v52 = vrot.slane %v1318_v14, %v285_v50  ;;  %v292_v54 = vrot.slane %v1340_v51, %v1331_v20  ;;  %p1184_p7 = por %p1183_p6, %p1182_p5 }
  0x50   :  { %933 = vmatmul.mubr.msk.f32.vlgmr.msra.gmra.mrb[0].mxu0 %vm84_vm0, %v77_v7  ;;  %999 = vmatprep.subr.bf16.mxu1 %v998_v10  ;;  %v305_v1 = vrot.slane %v1318_v14, %v304_v0 }
  0x51   :  { %1003 = vmatprep.subr.bf16.mxu0 %v1002_v41  ;;  %p1185_p8 = pnand %p1184_p7, %p1178_p4 }
  0x52   :  { %1005 = vmatpush3.bf16.msra.mxu0 %v1002_v41 }
  0x53   :  { %1001 = vmatpush3.bf16.msra.mxu1 %v998_v10  ;;  %1007 = vmatprep.subr.bf16.mxu0 %v1006_v43 }
  0x56   :  { %1009 = vmatpush3.bf16.msra.mxu0 %v1006_v43 }
 0x123   :  { %v934_v16 = vpop.f32.mrb[0].mxu0 }
 0x124   :  { %v157_v17 = vpop.f32.mrb[1].mxu0  ;;  %v1324_v19 = vadd.f32 %v934_v16, %v83_v15 }
 0x125   :  { %v1322_v18 = vadd.f32 %v157_v17, %v83_v15 }
 0x127   :  { %943 = vmatprep.mubr.msk.f32.mxu1 %vm174_vm1, %v1322_v18 }
 0x128   :  { %944 = vmatmul.mubr.msk.f32.vlgmr.msra.gmra.mrb[0].mxu1 %vm174_vm1, %v1324_v19 }
 0x1fb   :  { %v945_v22 = vpop.f32.mrb[0].mxu1 }
 0x1fc   :  { %v247_v23 = vpop.f32.mrb[1].mxu1  ;;  %v253_v25 = vadd.f32 %v945_v22, %v173_v21 }
 0x1fd   :  { %v248_v24 = vadd.f32 %v247_v23, %v173_v21 }
 0x1fe   :  { %v259_v27 = vsel %vm174_vm1, %v253_v25, 0.0 }
 0x1ff   :  { %v256_v26 = vsel %vm174_vm1, %v248_v24, 0.0 }
 0x200   :  { %257 = vadd.xlane.f32.xlu0 %v256_v26 }
 0x204   :  { %260 = vadd.xlane.f32.xlu0 %v259_v27 }
 0x28d   :  { %v258_v28 = vpop.xlane.xlu0 %257 }
 0x28e   :  { %v263_v29 = vmul.f32 0.03125, %v258_v28 }
 0x290   :  { %v265_v30 = vsub.f32 %v248_v24, %v263_v29 }
 0x291   :  { %v261_v31 = vpop.xlane.xlu0 %260 }
 0x292   :  { %v264_v32 = vmul.f32 0.03125, %v261_v31  ;;  %v267_v33 = vmul.f32 %v265_v30, %v265_v30 }
 0x294   :  { %v266_v34 = vsub.f32 %v253_v25, %v264_v32  ;;  %v269_v35 = vsel %vm174_vm1, %v267_v33, 0.0 }
 0x295   :  { %270 = vadd.xlane.f32.xlu1 %v269_v35 }
 0x296   :  { %v268_v36 = vmul.f32 %v266_v34, %v266_v34 }
 0x298   :  { %v272_v37 = vsel %vm174_vm1, %v268_v36, 0.0 }
 0x299   :  { %273 = vadd.xlane.f32.xlu1 %v272_v37 }
 0x322   :  { %v271_v44 = vpop.xlane.xlu1 %270 }
 0x323   :  { %v275_v45 = vmul.f32 0.03125, %v271_v44 }
 0x325   :  { %v277_v46 = vadd.f32 1e-05, %v275_v45 }
 0x326   :  { %v274_v47 = vpop.xlane.xlu1 %273 }
 0x327   :  { %1041 = vrsqrt.f32 %v277_v46  ;;  %v276_v48 = vmul.f32 0.03125, %v274_v47 }
 0x329   :  { %v278_v49 = vadd.f32 1e-05, %v276_v48 }
 0x32b   :  { %1043 = vrsqrt.f32 %v278_v49 }
 0x331   :  { %v1042_v53 = vpop.eup %1041 }
 0x332   :  { %v281_v55 = vmul.f32 %v1042_v53, %v265_v30  ;;  %v415_v30 = vsub.s32 6, %v1313_v12 }
 0x334   :  { %v287_v56 = vmul.f32 %v286_v52, %v281_v55  ;;  %v416_v31 = vrot.slane %v1318_v14, %v415_v30 }
 0x335   :  { %v1044_v57 = vpop.eup %1043 }
 0x336   :  { %v293_v58 = vadd.f32 %v292_v54, %v287_v56  ;;  %v282_v59 = vmul.f32 %v1044_v57, %v266_v34  ;;  %v422_v34 = vrot.slane %v1340_v51, %v304_v0 }
 0x338   :  { %1045 = vtanh.f32 %v293_v58  ;;  %v288_v60 = vmul.f32 %v286_v52, %v282_v59  ;;  %v471_v58 = vld [vmem:[#allocation7 + $0x48] sm:$0xff]  ;;  %v472_v59 = vld [vmem:[#allocation7 + $0x50] sm:$0xff] }
 0x33a   :  { %v294_v61 = vadd.f32 %v292_v54, %v288_v60 }
 0x33c   :  { %1047 = vtanh.f32 %v294_v61  ;;  %v473_v61 = vld [vmem:[#allocation7 + $0x58] sm:$0xff] }
 0x342   :  { %v1046_v62 = vpop.eup %1045 }
 0x343   :  { %954 = vmatprep.mubr.msk.f32.mxu0 %vm174_vm1, %v1046_v62  ;;  %v1014_v62 = vpack.c.bf16 %v473_v61, %v472_v59 }
 0x346   :  { %v1048_v63 = vpop.eup %1047 }
 0x347   :  { %955 = vmatmul.mubr.msk.f32.vlgmr.msra.gmra.mrb[2].mxu0 %vm174_vm1, %v1048_v63 }
 0x41a   :  { %v956_v2 = vpop.f32.mrb[2].mxu0 }
 0x41b   :  { %v384_v3 = vadd.f32 %v956_v2, %v305_v1  ;;  %v378_v4 = vpop.f32.mrb[3].mxu0 }
 0x41c   :  { %v379_v5 = vadd.f32 %v378_v4, %v305_v1 }
 0x41d   :  { %v390_v6 = vsel %vm174_vm1, %v384_v3, 0.0 }
 0x41e   :  { %391 = vadd.xlane.f32.xlu1 %v390_v6  ;;  %v387_v7 = vsel %vm174_vm1, %v379_v5, 0.0  ;;  %v458_v6 = vrot.slane %v1340_v51, %v285_v50  ;;  %v476_v50 = vsub.s32 3, %v1313_v12 }
 0x41f   :  { %388 = vadd.xlane.f32.xlu0 %v387_v7 }
 0x4ab   :  { %v392_v8 = vpop.xlane.xlu1 %391 }
 0x4ac   :  { %v394_v9 = vmul.f32 0.03125, %v392_v8  ;;  %v389_v10 = vpop.xlane.xlu0 %388 }
 0x4ad   :  { %v393_v11 = vmul.f32 0.03125, %v389_v10 }
 0x4ae   :  { %v396_v15 = vsub.f32 %v384_v3, %v394_v9 }
 0x4af   :  { %v395_v16 = vsub.f32 %v379_v5, %v393_v11  ;;  %v463_v5 = vsub.s32 7, %v1313_v12 }
 0x4b0   :  { %v398_v17 = vmul.f32 %v396_v15, %v396_v15 }
 0x4b1   :  { %v397_v21 = vmul.f32 %v395_v16, %v395_v16  ;;  %v464_v9 = vrot.slane %v1340_v51, %v463_v5 }
 0x4b2   :  { %v402_v22 = vsel %vm174_vm1, %v398_v17, 0.0 }
 0x4b3   :  { %403 = vadd.xlane.f32.xlu1 %v402_v22  ;;  %v399_v23 = vsel %vm174_vm1, %v397_v21, 0.0 }
 0x4b4   :  { %400 = vadd.xlane.f32.xlu0 %v399_v23 }
 0x540   :  { %v404_v24 = vpop.xlane.xlu1 %403 }
 0x541   :  { %v406_v25 = vmul.f32 0.03125, %v404_v24  ;;  %v401_v26 = vpop.xlane.xlu0 %400  ;;  %v477_v24 = vrot.slane %v1318_v14, %v476_v50 }
 0x542   :  { %v405_v27 = vmul.f32 0.03125, %v401_v26 }
 0x543   :  { %v408_v28 = vadd.f32 1e-05, %v406_v25 }
 0x544   :  { %v407_v29 = vadd.f32 1e-05, %v405_v27 }
 0x545   :  { %1049 = vrsqrt.f32 %v408_v28 }
 0x546   :  { %1051 = vrsqrt.f32 %v407_v29 }
 0x54f   :  { %v1050_v32 = vpop.eup %1049 }
 0x550   :  { %v1052_v33 = vpop.eup %1051  ;;  %v412_v35 = vmul.f32 %v1050_v32, %v396_v15 }
 0x551   :  { %v411_v36 = vmul.f32 %v1052_v33, %v395_v16 }
 0x552   :  { %v418_v37 = vmul.f32 %v416_v31, %v412_v35 }
 0x553   :  { %v417_v38 = vmul.f32 %v416_v31, %v411_v36 }
 0x554   :  { %v424_v39 = vadd.f32 %v422_v34, %v418_v37 }
 0x555   :  { %v423_v40 = vadd.f32 %v422_v34, %v417_v38 }
 0x556   :  { %1053 = vtanh.f32 %v424_v39 }
 0x557   :  { %1055 = vtanh.f32 %v423_v40 }
 0x560   :  { %v1054_v41 = vpop.eup %1053 }
 0x561   :  { %v1056_v42 = vpop.eup %1055  ;;  %v428_v43 = vadd.f32 %v1054_v41, %v1324_v19 }
 0x562   :  { %v427_v44 = vadd.f32 %v1056_v42, %v1322_v18  ;;  %v470_v18 = vld [vmem:[#allocation7 + $0x40] sm:$0xff] }
 0x563   :  { %v432_v45 = vsel %vm174_vm1, %v428_v43, 0.0  ;;  %v1010_v60 = vpack.c.bf16 %v471_v58, %v470_v18  ;;  %v600_v42 = vld [vmem:[#allocation7 + $0x60] sm:$0xff]  ;;  %v594_v18 = vrot.slane %v1340_v51, %v476_v50 }
 0x564   :  { %433 = vadd.xlane.f32.xlu1 %v432_v45  ;;  %v429_v46 = vsel %vm174_vm1, %v427_v44, 0.0 }
 0x565   :  { %430 = vadd.xlane.f32.xlu0 %v429_v46  ;;  %1011 = vmatprep.subr.bf16.mxu1 %v1010_v60  ;;  %v603_v46 = vld [vmem:[#allocation7 + $0x78] sm:$0xff] }
 0x566   :  { %1013 = vmatpush3.bf16.msra.mxu1 %v1010_v60 }
 0x567   :  { %1015 = vmatprep.subr.bf16.mxu1 %v1014_v62 }
 0x56a   :  { %1017 = vmatpush3.bf16.msra.mxu1 %v1014_v62 }
 0x5f1   :  { %v434_v47 = vpop.xlane.xlu1 %433 }
 0x5f2   :  { %v436_v48 = vmul.f32 0.03125, %v434_v47  ;;  %v431_v49 = vpop.xlane.xlu0 %430 }
 0x5f3   :  { %v435_v52 = vmul.f32 0.03125, %v431_v49 }
 0x5f4   :  { %v438_v53 = vsub.f32 %v428_v43, %v436_v48  ;;  %v601_v43 = vld [vmem:[#allocation7 + $0x68] sm:$0xff] }
 0x5f5   :  { %v437_v54 = vsub.f32 %v427_v44, %v435_v52  ;;  %v602_v44 = vld [vmem:[#allocation7 + $0x70] sm:$0xff]  ;;  %v1018_v45 = vpack.c.bf16 %v601_v43, %v600_v42 }
 0x5f6   :  { %v440_v55 = vmul.f32 %v438_v53, %v438_v53  ;;  %v1022_v47 = vpack.c.bf16 %v603_v46, %v602_v44 }
 0x5f7   :  { %v439_v56 = vmul.f32 %v437_v54, %v437_v54  ;;  %1019 = vmatprep.subr.bf16.mxu0 %v1018_v45 }
 0x5f8   :  { %v444_v57 = vsel %vm174_vm1, %v440_v55, 0.0  ;;  %1021 = vmatpush3.bf16.msra.mxu0 %v1018_v45 }
 0x5f9   :  { %445 = vadd.xlane.f32.xlu1 %v444_v57  ;;  %v441_v19 = vsel %vm174_vm1, %v439_v56, 0.0  ;;  %1023 = vmatprep.subr.bf16.mxu0 %v1022_v47  ;;  %v588_v56 = vrot.slane %v1318_v14, %v463_v5 }
 0x5fa   :  { %442 = vadd.xlane.f32.xlu0 %v441_v19 }
 0x5fc   :  { %1025 = vmatpush3.bf16.msra.mxu0 %v1022_v47 }
 0x686   :  { %v446_v63 = vpop.xlane.xlu1 %445 }
 0x687   :  { %v448_v0 = vmul.f32 0.03125, %v446_v63  ;;  %v443_v1 = vpop.xlane.xlu0 %442 }
 0x688   :  { %v447_v2 = vmul.f32 0.03125, %v443_v1 }
 0x689   :  { %v450_v3 = vadd.f32 1e-05, %v448_v0 }
 0x68a   :  { %v449_v4 = vadd.f32 1e-05, %v447_v2  ;;  %v606_v2 = vsub.s32 4, %v1313_v12 }
 0x68b   :  { %1057 = vrsqrt.f32 %v450_v3 }
 0x68c   :  { %1059 = vrsqrt.f32 %v449_v4  ;;  %v607_v3 = vrot.slane %v1318_v14, %v606_v2 }
 0x695   :  { %v1058_v7 = vpop.eup %1057 }
 0x696   :  { %v1060_v8 = vpop.eup %1059  ;;  %v454_v10 = vmul.f32 %v1058_v7, %v438_v53 }
 0x697   :  { %v453_v11 = vmul.f32 %v1060_v8, %v437_v54 }
 0x698   :  { %v460_v15 = vmul.f32 %v458_v6, %v454_v10 }
 0x699   :  { %v459_v16 = vmul.f32 %v458_v6, %v453_v11 }
 0x69a   :  { %v466_v17 = vadd.f32 %v464_v9, %v460_v15 }
 0x69b   :  { %v465_v21 = vadd.f32 %v464_v9, %v459_v16 }
 0x69d   :  { %1061 = vtanh.f32 %v465_v21 }
 0x69e   :  { %1063 = vtanh.f32 %v466_v17 }
 0x6a7   :  { %v1371_v22 = vpop.eup %1061 }
 0x6a8   :  { %v1373_v23 = vpop.eup %1063  ;;  %965 = vmatprep.mubr.msk.f32.mxu1 %vm174_vm1, %v1371_v22 }
 0x6a9   :  { %966 = vmatmul.mubr.msk.f32.vlgmr.msra.gmra.mrb[2].mxu1 %vm174_vm1, %v1373_v23 }
 0x77c   :  { %v967_v25 = vpop.f32.mrb[2].mxu1 }
 0x77d   :  { %v556_v26 = vadd.f32 %v967_v25, %v477_v24  ;;  %v550_v27 = vpop.f32.mrb[3].mxu1 }
 0x77e   :  { %v551_v28 = vadd.f32 %v550_v27, %v477_v24 }
 0x77f   :  { %v562_v29 = vsel %vm174_vm1, %v556_v26, 0.0 }
 0x780   :  { %563 = vadd.xlane.f32.xlu1 %v562_v29  ;;  %v559_v31 = vsel %vm174_vm1, %v551_v28, 0.0 }
 0x781   :  { %560 = vadd.xlane.f32.xlu0 %v559_v31 }
 0x80d   :  { %v564_v32 = vpop.xlane.xlu1 %563 }
 0x80e   :  { %v566_v33 = vmul.f32 0.03125, %v564_v32  ;;  %v561_v34 = vpop.xlane.xlu0 %560 }
 0x80f   :  { %v565_v35 = vmul.f32 0.03125, %v561_v34 }
 0x810   :  { %v568_v36 = vsub.f32 %v556_v26, %v566_v33  ;;  %v718_v33 = vrot.slane %v1340_v51, %v1316_v13 }
 0x811   :  { %v567_v37 = vsub.f32 %v551_v28, %v565_v35 }
 0x812   :  { %v570_v38 = vmul.f32 %v568_v36, %v568_v36 }
 0x813   :  { %v569_v39 = vmul.f32 %v567_v37, %v567_v37 }
 0x814   :  { %v574_v40 = vsel %vm174_vm1, %v570_v38, 0.0 }
 0x815   :  { %575 = vadd.xlane.f32.xlu1 %v574_v40  ;;  %v571_v41 = vsel %vm174_vm1, %v569_v39, 0.0 }
 0x816   :  { %572 = vadd.xlane.f32.xlu0 %v571_v41 }
 0x8a2   :  { %v576_v48 = vpop.xlane.xlu1 %575 }
 0x8a3   :  { %v578_v49 = vmul.f32 0.03125, %v576_v48  ;;  %v573_v52 = vpop.xlane.xlu0 %572 }
 0x8a4   :  { %v577_v53 = vmul.f32 0.03125, %v573_v52 }
 0x8a5   :  { %v580_v54 = vadd.f32 1e-05, %v578_v49 }
 0x8a6   :  { %v579_v55 = vadd.f32 1e-05, %v577_v53 }
 0x8a7   :  { %1065 = vrsqrt.f32 %v580_v54 }
 0x8a8   :  { %1067 = vrsqrt.f32 %v579_v55 }
 0x8b1   :  { %v1066_v57 = vpop.eup %1065 }
 0x8b2   :  { %v1068_v19 = vpop.eup %1067  ;;  %v584_v58 = vmul.f32 %v1066_v57, %v568_v36  ;;  %v724_v36 = vrot.slane %v1340_v51, %v606_v2 }
 0x8b3   :  { %v583_v59 = vmul.f32 %v1068_v19, %v567_v37 }
 0x8b4   :  { %v590_v60 = vmul.f32 %v588_v56, %v584_v58  ;;  %v773_v58 = vld [vmem:[#allocation7 + $0x88] sm:$0xff] }
 0x8b5   :  { %v589_v61 = vmul.f32 %v588_v56, %v583_v59  ;;  %v774_v59 = vld [vmem:[#allocation7 + $0x90] sm:$0xff] }
 0x8b6   :  { %v596_v62 = vadd.f32 %v594_v18, %v590_v60 }
 0x8b7   :  { %v595_v63 = vadd.f32 %v594_v18, %v589_v61  ;;  %v775_v61 = vld [vmem:[#allocation7 + $0x98] sm:$0xff] }
 0x8b9   :  { %1069 = vtanh.f32 %v595_v63 }
 0x8ba   :  { %1071 = vtanh.f32 %v596_v62  ;;  %v1030_v62 = vpack.c.bf16 %v775_v61, %v774_v59 }
 0x8c3   :  { %v1070_v0 = vpop.eup %1069 }
 0x8c4   :  { %v1072_v1 = vpop.eup %1071  ;;  %976 = vmatprep.mubr.msk.f32.mxu0 %vm174_vm1, %v1070_v0 }
 0x8c5   :  { %977 = vmatmul.mubr.msk.f32.vlgmr.msra.gmra.mrb[4].mxu0 %vm174_vm1, %v1072_v1 }
 0x998   :  { %v978_v4 = vpop.f32.mrb[4].mxu0 }
 0x999   :  { %v686_v5 = vadd.f32 %v978_v4, %v607_v3  ;;  %v680_v6 = vpop.f32.mrb[5].mxu0 }
 0x99a   :  { %v681_v7 = vadd.f32 %v680_v6, %v607_v3  ;;  %v760_v6 = vrot.slane %v1340_v51, %v415_v30 }
 0x99b   :  { %v692_v8 = vsel %vm174_vm1, %v686_v5, 0.0 }
 0x99c   :  { %693 = vadd.xlane.f32.xlu1 %v692_v8  ;;  %v689_v9 = vsel %vm174_vm1, %v681_v7, 0.0 }
 0x99d   :  { %690 = vadd.xlane.f32.xlu0 %v689_v9 }
 0xa29   :  { %v694_v10 = vpop.xlane.xlu1 %693 }
 0xa2a   :  { %v696_v11 = vmul.f32 0.03125, %v694_v10  ;;  %v691_v15 = vpop.xlane.xlu0 %690 }
 0xa2b   :  { %v695_v16 = vmul.f32 0.03125, %v691_v15 }
 0xa2c   :  { %v698_v17 = vsub.f32 %v686_v5, %v696_v11  ;;  %v75_v5 = vld [vmem:[#allocation8 + $0x10] sm:$0x3] }
 0xa2d   :  { %v697_v21 = vsub.f32 %v681_v7, %v695_v16  ;;  %v766_v9 = vrot.slane %v75_v5, %v1316_v13  ;;  %v779_v12 = vrot.slane %v75_v5, %v1331_v20 }
 0xa2e   :  { %v700_v50 = vmul.f32 %v698_v17, %v698_v17 }
 0xa2f   :  { %v699_v24 = vmul.f32 %v697_v21, %v697_v21 }
 0xa30   :  { %v704_v14 = vsel %vm174_vm1, %v700_v50, 0.0 }
 0xa31   :  { %705 = vadd.xlane.f32.xlu1 %v704_v14  ;;  %v701_v25 = vsel %vm174_vm1, %v699_v24, 0.0 }
 0xa32   :  { %702 = vadd.xlane.f32.xlu0 %v701_v25 }
 0xabe   :  { %v706_v26 = vpop.xlane.xlu1 %705 }
 0xabf   :  { %v708_v27 = vmul.f32 0.03125, %v706_v26  ;;  %v703_v28 = vpop.xlane.xlu0 %702 }
 0xac0   :  { %v707_v29 = vmul.f32 0.03125, %v703_v28 }
 0xac1   :  { %v710_v31 = vadd.f32 1e-05, %v708_v27 }
 0xac2   :  { %v709_v32 = vadd.f32 1e-05, %v707_v29 }
 0xac3   :  { %1073 = vrsqrt.f32 %v710_v31 }
 0xac4   :  { %1075 = vrsqrt.f32 %v709_v32 }
 0xacd   :  { %v1074_v34 = vpop.eup %1073 }
 0xace   :  { %v1076_v35 = vpop.eup %1075  ;;  %v714_v37 = vmul.f32 %v1074_v34, %v698_v17 }
 0xacf   :  { %v713_v38 = vmul.f32 %v1076_v35, %v697_v21 }
 0xad0   :  { %v720_v39 = vmul.f32 %v718_v33, %v714_v37 }
 0xad1   :  { %v719_v40 = vmul.f32 %v718_v33, %v713_v38 }
 0xad2   :  { %v726_v41 = vadd.f32 %v724_v36, %v720_v39 }
 0xad3   :  { %v725_v42 = vadd.f32 %v724_v36, %v719_v40 }
 0xad4   :  { %1077 = vtanh.f32 %v726_v41 }
 0xad5   :  { %1079 = vtanh.f32 %v725_v42 }
 0xade   :  { %v1078_v43 = vpop.eup %1077 }
 0xadf   :  { %v1080_v44 = vpop.eup %1079  ;;  %v730_v45 = vadd.f32 %v1078_v43, %v1373_v23 }
 0xae0   :  { %v729_v46 = vadd.f32 %v1080_v44, %v1371_v22  ;;  %v772_v22 = vld [vmem:[#allocation7 + $0x80] sm:$0xff] }
 0xae1   :  { %v734_v47 = vsel %vm174_vm1, %v730_v45, 0.0  ;;  %v1026_v60 = vpack.c.bf16 %v773_v58, %v772_v22 }
 0xae2   :  { %735 = vadd.xlane.f32.xlu1 %v734_v47  ;;  %v731_v48 = vsel %vm174_vm1, %v729_v46, 0.0 }
 0xae3   :  { %732 = vadd.xlane.f32.xlu0 %v731_v48  ;;  %1027 = vmatprep.subr.bf16.mxu1 %v1026_v60 }
 0xae4   :  { %1029 = vmatpush3.bf16.msra.mxu1 %v1026_v60 }
 0xae5   :  { %1031 = vmatprep.subr.bf16.mxu1 %v1030_v62 }
 0xae8   :  { %1033 = vmatpush3.bf16.msra.mxu1 %v1030_v62 }
 0xb6f   :  { %v736_v49 = vpop.xlane.xlu1 %735 }
 0xb70   :  { %v738_v52 = vmul.f32 0.03125, %v736_v49  ;;  %v733_v53 = vpop.xlane.xlu0 %732 }
 0xb71   :  { %v737_v54 = vmul.f32 0.03125, %v733_v53 }
 0xb72   :  { %v740_v55 = vsub.f32 %v730_v45, %v738_v52 }
 0xb73   :  { %v739_v56 = vsub.f32 %v729_v46, %v737_v54 }
 0xb74   :  { %v742_v57 = vmul.f32 %v740_v55, %v740_v55 }
 0xb75   :  { %v741_v19 = vmul.f32 %v739_v56, %v739_v56 }
 0xb76   :  { %v746_v18 = vsel %vm174_vm1, %v742_v57, 0.0 }
 0xb77   :  { %747 = vadd.xlane.f32.xlu1 %v746_v18  ;;  %v743_v23 = vsel %vm174_vm1, %v741_v19, 0.0 }
 0xb78   :  { %744 = vadd.xlane.f32.xlu0 %v743_v23 }
 0xc04   :  { %v748_v63 = vpop.xlane.xlu1 %747 }
 0xc05   :  { %v750_v0 = vmul.f32 0.03125, %v748_v63  ;;  %v745_v1 = vpop.xlane.xlu0 %744 }
 0xc06   :  { %v749_v2 = vmul.f32 0.03125, %v745_v1 }
 0xc07   :  { %v752_v3 = vadd.f32 1e-05, %v750_v0 }
 0xc08   :  { %v751_v4 = vadd.f32 1e-05, %v749_v2 }
 0xc09   :  { %1081 = vrsqrt.f32 %v752_v3 }
 0xc0a   :  { %1083 = vrsqrt.f32 %v751_v4 }
 0xc13   :  { %v1082_v7 = vpop.eup %1081 }
 0xc14   :  { %v1084_v8 = vpop.eup %1083  ;;  %v756_v10 = vmul.f32 %v1082_v7, %v740_v55 }
 0xc15   :  { %v755_v11 = vmul.f32 %v1084_v8, %v739_v56 }
 0xc16   :  { %v762_v15 = vmul.f32 %v760_v6, %v756_v10 }
 0xc17   :  { %v761_v16 = vmul.f32 %v760_v6, %v755_v11 }
 0xc18   :  { %v768_v17 = vadd.f32 %v766_v9, %v762_v15 }
 0xc19   :  { %v767_v21 = vadd.f32 %v766_v9, %v761_v16 }
 0xc1b   :  { %1085 = vtanh.f32 %v767_v21 }
 0xc1c   :  { %1087 = vtanh.f32 %v768_v17 }
 0xc25   :  { %v1086_v50 = vpop.eup %1085 }
 0xc26   :  { %v1088_v24 = vpop.eup %1087  ;;  %987 = vmatprep.mubr.msk.f32.mxu1 %vm174_vm1, %v1086_v50 }
 0xc27   :  { %988 = vmatmul.mubr.msk.f32.vlgmr.msra.gmra.mrb[4].mxu1 %vm174_vm1, %v1088_v24 }
 0xcfa   :  { %v989_v51 = vpop.f32.mrb[4].mxu1 }
 0xcfb   :  { %v858_v13 = vadd.f32 %v989_v51, %v779_v12  ;;  %v852_v30 = vpop.f32.mrb[5].mxu1 }
 0xcfc   :  { %v853_v14 = vadd.f32 %v852_v30, %v779_v12 }
 0xcfd   :  { %862 = vst.msk [vmem:[#allocation10 + $0x8] sm:$0xff] %vm174_vm1, %v858_v13 }
 0xcfe   :  { %861 = vst.msk [vmem:[#allocation10] sm:$0xff] %vm174_vm1, %v853_v14 }
 0xcff   :  { %1188 = shalt.err (!%p1185_p8)
}
 0xd00   :  { %s1189_s15 = scalar_lea.hbm %s1432_s4, 256 }
 0xd01   :  { %p1190_p9 = scmp.ne.s32.totalorder %s1432_s4, %s1189_s15  ;;  %p1193_p10 = scmp.lt.u32.totalorder %s1189_s15, %s1432_s4 }
 0xd03   :  { %p1195_p11 = pnand %p1193_p10, %p1190_p9 }
 0xd05   :  { %1198 = shalt.err (!%p1195_p11)
}
 0xd06   :  { %874 = dma.vmem_to_hbm [thread:$0]  %s869_s12, 256, %s1432_s4, [#allocation4], %s1209_s27, %s1209_s27, %s1210_s28  }
 0xd07   :  { %1205 = dma.done.wait [#allocation4], 256  }
 0xd08   :  { %1206 = vsyncadd [#allocation4], 4294967040 }
 0xd09   :  { %878 = vsyncpa [#allocation3], 1 }
 0xd0a   :  { %879 = vsyncpa [#allocation6], 1 }
 0xd0b   :  { %880 = vsyncpa [#allocation9], 1 }
 0xd0c   :  { %881 = vsyncpa [#allocation4], 1 }

</bundles_post_ra>
